<compile_context>
chip_gen: v7x
topology: tpu7x:2x2x1
jax: 0.10.0
libtpu: 0.0.40
codegen_flags: <defaults>
</compile_context>

<pallas_src>
import functools

import jax
import jax.numpy as jnp
from jax import lax
from jax.experimental import pallas as pl
from jax.experimental.pallas import tpu as pltpu


# --------------------------------------------------------------------------- helpers
def _vmem_budget_bytes():
    """Per-TensorCore VMEM capacity, clamped to a sane range (64 MiB on v7x)."""
    try:
        cap = int(pltpu.get_tpu_info().vmem_capacity_bytes)
        return max(16 << 20, min(cap, 128 << 20))
    except Exception:
        return 64 << 20


def _no_bf16_vpu():
    """True on generations without a bf16 VPU (v5e and older) -> keep f32 compute."""
    try:
        kind = jax.devices()[0].device_kind.lower()
        return any(t in kind for t in ("v2", "v3", "v4", "v5"))
    except Exception:
        return False


def _sigmoid(z, approx):
    if approx:
        # exp on EUP + approximate reciprocal: frees VPU slots (bf16 path only).
        return pl.reciprocal(1.0 + jnp.exp(-z), approx=True)
    return jax.nn.sigmoid(z)


def _tail_bytes(C, Cr, lanes, r_isz, x_isz, o_isz, cd_isz):
    """VMEM bytes per grid step: double-buffered r/x/out blocks + in-kernel temps."""
    return (2 * C * lanes * (r_isz + x_isz + o_isz)   # pipeline (double-buffered) blocks
            + 3 * C * lanes * cd_isz                  # r / s / out compute-dtype temps
            + 4 * Cr * lanes + 8 * lanes)             # hp (f32) + per-pixel gate rows


def _pick_tile(HW, C, Cr, r_isz, x_isz, o_isz, cd_isz, budget):
    """Budget-derived spatial tile (lanes) and grid extent for the tiled path."""
    per_lane = _tail_bytes(C, Cr, 1, r_isz, x_isz, o_isz, cd_isz)
    max_tile = max(128, (int(0.25 * budget) // per_lane) // 128 * 128)
    if HW <= max_tile:
        # Single block spanning the whole row: legal for any HW (equals full dim),
        # lane-dense whenever HW is a multiple of 128.
        return HW, 1
    # Last block may overhang HW; Pallas masks boundary reads/writes and every
    # op in the tiled kernel is lane-local, so garbage lanes never leak.
    return max_tile, (HW + max_tile - 1) // max_tile


# --------------------------------------------------------------------------- kernels
def _fused_ca_pa_kernel(r_ref, x_ref,
                        wc1_ref, bc1_ref, wc2_ref, bc2_ref,
                        wp1_ref, bp1_ref, wp2_ref, bp2_ref,
                        o_ref, *, inv_hw, compute_dtype, approx_sigmoid):
    """Whole (C, HW) image per grid step: CA pool+gate, PA gate, residual."""
    cd = compute_dtype
    r = r_ref[0].astype(cd)                                        # (C, HW)

    # CALayer: global average pool with f32 accumulation.
    if cd == jnp.float32:
        pooled = jnp.sum(r, axis=-1, keepdims=True) * inv_hw       # exact f32
    else:
        ones = jnp.ones((r.shape[-1], 1), cd)
        pooled = jnp.dot(r, ones, preferred_element_type=jnp.float32) * inv_hw
    h = jnp.maximum(jnp.dot(wc1_ref[...], pooled,
                            preferred_element_type=jnp.float32) + bc1_ref[...], 0.0)
    yca = _sigmoid(jnp.dot(wc2_ref[...], h,
                           preferred_element_type=jnp.float32) + bc2_ref[...],
                   approx_sigmoid)                                 # (C, 1) f32
    s = r * yca.astype(cd)                                         # (C, HW)

    # PALayer: two 1x1 convs over channels -> per-pixel gate (matvecs on the MXU).
    hp = jnp.maximum(jnp.dot(wp1_ref[...], s,
                             preferred_element_type=jnp.float32) + bp1_ref[...], 0.0)
    z = jnp.dot(wp2_ref[...], hp, preferred_element_type=jnp.float32) + bp2_ref[...]
    a = _sigmoid(z, approx_sigmoid)                                # (1, HW) f32

    out = s * a.astype(cd) + x_ref[0].astype(cd)
    o_ref[0] = out.astype(o_ref.dtype)


def _tiled_ca_pa_kernel(r_ref, x_ref, yca_ref,
                        wp1_ref, bp1_ref, wp2_ref, bp2_ref,
                        o_ref, *, compute_dtype, approx_sigmoid):
    """Spatially tiled apply pass: CA gate precomputed, PA + residual per tile."""
    cd = compute_dtype
    r = r_ref[0].astype(cd)                                        # (C, T)
    s = r * yca_ref[0].astype(cd)                                  # (C, 1) broadcast
    hp = jnp.maximum(jnp.dot(wp1_ref[...], s,
                             preferred_element_type=jnp.float32) + bp1_ref[...], 0.0)
    z = jnp.dot(wp2_ref[...], hp, preferred_element_type=jnp.float32) + bp2_ref[...]
    a = _sigmoid(z, approx_sigmoid)                                # (1, T) f32
    out = s * a.astype(cd) + x_ref[0].astype(cd)
    o_ref[0] = out.astype(o_ref.dtype)


# --------------------------------------------------------------------------- wrapper
def ca_pa_residual(r, x_orig, params, *, io_dtype=None,
                   force_tiled=False, force_fused=False, fused_min_batch=8):
    """out = PALayer(CALayer(r)) + x_orig with the attention tail in Pallas."""
    N, C, H, W = r.shape
    HW = H * W
    Cr = params["wc1"].shape[0]
    io_dtype = jnp.dtype(io_dtype) if io_dtype is not None else jnp.dtype(r.dtype)

    # Compute dtype for the big (C, lanes) temporaries: bf16 on bf16-VPU chips
    # (v6e/v7x) when I/O is bf16, else f32. Pool + tiny MLPs always accumulate f32.
    cd = jnp.bfloat16 if (io_dtype == jnp.bfloat16 and not _no_bf16_vpu()) else jnp.float32
    approx = (cd == jnp.bfloat16)

    # io-dtype cast of r fuses into conv2's bias-add epilogue under jit (no extra
    # HBM pass); x is read at its native dtype and cast per-block inside the kernel.
    r3 = r.astype(io_dtype).reshape(N, C, HW)
    x3 = x_orig.reshape(N, C, HW)

    f32 = jnp.float32
    wc1 = params["wc1"].astype(f32)                    # (Cr, C)
    bc1 = params["bc1"].reshape(Cr, 1).astype(f32)
    wc2 = params["wc2"].astype(f32)                    # (C, Cr)
    bc2 = params["bc2"].reshape(C, 1).astype(f32)
    wp1 = params["wp1"].astype(cd)                     # (Cr, C), MXU input dtype
    bp1 = params["bp1"].reshape(Cr, 1).astype(f32)
    wp2 = params["wp2"].reshape(1, Cr).astype(f32)
    bp2 = params["bp2"].reshape(1, 1).astype(f32)

    r_isz = io_dtype.itemsize
    x_isz = jnp.dtype(x_orig.dtype).itemsize
    o_isz = io_dtype.itemsize
    cd_isz = jnp.dtype(cd).itemsize
    budget = _vmem_budget_bytes()

    # Fused single-pass path only when the whole (C, HW) image + its in-kernel
    # temporaries fits half the VMEM budget AND the batch is big enough that
    # grid=(N,) still pipelines DMA/compute and feeds both TCs on v7x.
    fused_bytes = _tail_bytes(C, Cr, HW, r_isz, x_isz, o_isz, cd_isz)
    use_fused = ((not force_tiled)
                 and fused_bytes <= int(0.5 * budget)
                 and (force_fused or N >= fused_min_batch))

    if use_fused:
        vmem_limit = int(min(budget, max(fused_bytes + (24 << 20), 48 << 20)))
        kern = functools.partial(_fused_ca_pa_kernel, inv_hw=1.0 / HW,
                                 compute_dtype=cd, approx_sigmoid=approx)
        out = pl.pallas_call(
            kern,
            out_shape=jax.ShapeDtypeStruct((N, C, HW), io_dtype),
            grid_spec=pltpu.PrefetchScalarGridSpec(
                num_scalar_prefetch=0,
                grid=(N,),
                in_specs=[
                    pl.BlockSpec((1, C, HW), lambda n: (n, 0, 0)),
                    pl.BlockSpec((1, C, HW), lambda n: (n, 0, 0)),
                    pl.BlockSpec((Cr, C), lambda n: (0, 0)),
                    pl.BlockSpec((Cr, 1), lambda n: (0, 0)),
                    pl.BlockSpec((C, Cr), lambda n: (0, 0)),
                    pl.BlockSpec((C, 1), lambda n: (0, 0)),
                    pl.BlockSpec((Cr, C), lambda n: (0, 0)),
                    pl.BlockSpec((Cr, 1), lambda n: (0, 0)),
                    pl.BlockSpec((1, Cr), lambda n: (0, 0)),
                    pl.BlockSpec((1, 1), lambda n: (0, 0)),
                ],
                out_specs=pl.BlockSpec((1, C, HW), lambda n: (n, 0, 0)),
            ),
            compiler_params=pltpu.CompilerParams(
                dimension_semantics=("parallel",),
                vmem_limit_bytes=vmem_limit),
        )(r3, x3, wc1, bc1, wc2, bc2, wp1, bp1, wp2, bp2)
        return out.reshape(N, C, H, W)

    # ---------------- two-pass path (default for small N / big images) ----------------
    # Pass 1: tiny CA gate. Reads r once at io_dtype width with f32 accumulation;
    # the reduce + cast fuse in XLA (no extra materialized copy of r).
    pooled = jnp.mean(r3, axis=-1, dtype=f32)                         # (N, C)
    h = jnp.maximum(pooled @ wc1.T + params["bc1"].astype(f32), 0.0)
    yca = jax.nn.sigmoid(h @ wc2.T + params["bc2"].astype(f32))       # (N, C)
    yca = yca[:, :, None]                                             # (N, C, 1) f32

    # Pass 2: spatially tiled apply kernel; tile derived from the VMEM budget so
    # DMAs are large and the ~0.35us/grid-step overhead is amortized.
    tile, n_tiles = _pick_tile(HW, C, Cr, r_isz, x_isz, o_isz, cd_isz, budget)
    tiled_bytes = _tail_bytes(C, Cr, tile, r_isz, x_isz, o_isz, cd_isz)
    vmem_limit = int(min(budget, max(tiled_bytes + (16 << 20), 32 << 20)))
    kern = functools.partial(_tiled_ca_pa_kernel, compute_dtype=cd, approx_sigmoid=approx)
    out = pl.pallas_call(
        kern,
        out_shape=jax.ShapeDtypeStruct((N, C, HW), io_dtype),
        grid_spec=pltpu.PrefetchScalarGridSpec(
            num_scalar_prefetch=0,
            grid=(N, n_tiles),
            in_specs=[
                pl.BlockSpec((1, C, tile), lambda n, t: (n, 0, t)),
                pl.BlockSpec((1, C, tile), lambda n, t: (n, 0, t)),
                pl.BlockSpec((1, C, 1), lambda n, t: (n, 0, 0)),
                pl.BlockSpec((Cr, C), lambda n, t: (0, 0)),
                pl.BlockSpec((Cr, 1), lambda n, t: (0, 0)),
                pl.BlockSpec((1, Cr), lambda n, t: (0, 0)),
                pl.BlockSpec((1, 1), lambda n, t: (0, 0)),
            ],
            out_specs=pl.BlockSpec((1, C, tile), lambda n, t: (n, 0, t)),
        ),
        compiler_params=pltpu.CompilerParams(
            dimension_semantics=("parallel", "parallel"),
            vmem_limit_bytes=vmem_limit),
    )(r3, x3, yca, wp1, bp1, wp2, bp2)
    return out.reshape(N, C, H, W)


# --------------------------------------------------------------------------- full block
def _conv2d(x, w, b, k):
    y = lax.conv_general_dilated(
        x, w, (1, 1), [(k // 2, k // 2), (k // 2, k // 2)],
        dimension_numbers=("NCHW", "OIHW", "NCHW"))
    return y + b[None, :, None, None]


def dehaze_block(x, params, *, kernel_size=3, io_dtype=None,
                 force_tiled=False, force_fused=False):
    """x: (N, C, H, W). DehazeBlock forward; attention tail runs in Pallas."""
    r = jnp.maximum(_conv2d(x, params["w_conv1"], params["b_conv1"], kernel_size), 0.0)
    r = r + x
    r = _conv2d(r, params["w_conv2"], params["b_conv2"], kernel_size)
    return ca_pa_residual(r, x, params, io_dtype=io_dtype,
                          force_tiled=force_tiled, force_fused=force_fused)


# --------------------------------------------------------------------------- reference
def dehaze_block_ref(x, params, *, kernel_size=3):
    r = jnp.maximum(_conv2d(x, params["w_conv1"], params["b_conv1"], kernel_size), 0.0)
    r = r + x
    r = _conv2d(r, params["w_conv2"], params["b_conv2"], kernel_size)
    # CALayer
    pooled = jnp.mean(r, axis=(2, 3))
    h = jnp.maximum(pooled @ params["wc1"].T + params["bc1"], 0.0)
    yca = jax.nn.sigmoid(h @ params["wc2"].T + params["bc2"])
    r = r * yca[:, :, None, None]
    # PALayer
    hp = jnp.maximum(jnp.einsum("oc,nchw->nohw", params["wp1"], r)
                     + params["bp1"][None, :, None, None], 0.0)
    a = jax.nn.sigmoid(jnp.einsum("oc,nchw->nohw", params["wp2"], hp)
                       + params["bp2"][None, :, None, None])
    return r * a + x


if __name__ == "__main__":
    N, C, H, W = 2, 32, 16, 16   # C divisible by 8 (channel // 8 bottleneck)
    K = 3
    Cr = C // 8

    key = jax.random.PRNGKey(0)
    ks = jax.random.split(key, 14)
    x = jax.random.normal(ks[0], (N, C, H, W), dtype=jnp.float32)
    params = {
        "w_conv1": jax.random.normal(ks[1], (C, C, K, K), jnp.float32) * 0.05,
        "b_conv1": jax.random.normal(ks[2], (C,), jnp.float32) * 0.05,
        "w_conv2": jax.random.normal(ks[3], (C, C, K, K), jnp.float32) * 0.05,
        "b_conv2": jax.random.normal(ks[4], (C,), jnp.float32) * 0.05,
        "wc1": jax.random.normal(ks[5], (Cr, C), jnp.float32) * 0.1,
        "bc1": jax.random.normal(ks[6], (Cr,), jnp.float32) * 0.1,
        "wc2": jax.random.normal(ks[7], (C, Cr), jnp.float32) * 0.1,
        "bc2": jax.random.normal(ks[8], (C,), jnp.float32) * 0.1,
        "wp1": jax.random.normal(ks[9], (Cr, C), jnp.float32) * 0.1,
        "bp1": jax.random.normal(ks[10], (Cr,), jnp.float32) * 0.1,
        "wp2": jax.random.normal(ks[11], (1, Cr), jnp.float32) * 0.1,
        "bp2": jax.random.normal(ks[12], (1,), jnp.float32) * 0.1,
    }

    ref = jax.block_until_ready(dehaze_block_ref(x, params, kernel_size=K))

    # 1) Default path: N=2 < fused_min_batch -> tiled two-pass kernel, f32 I/O.
    fwd_tiled = jax.jit(functools.partial(dehaze_block, kernel_size=K))
    out_tiled = jax.block_until_ready(fwd_tiled(x, params))
    assert out_tiled.shape == (N, C, H, W)
    assert jnp.allclose(out_tiled, ref, atol=5e-4, rtol=5e-4)

    # 2) Fused single-pass path (forced; auto-selected for N >= 8 when VMEM fits).
    fwd_fused = jax.jit(functools.partial(dehaze_block, kernel_size=K, force_fused=True))
    out_fused = jax.block_until_ready(fwd_fused(x, params))
    assert jnp.allclose(out_fused, ref, atol=5e-4, rtol=5e-4)

    # 3) bf16 I/O (bf16 compute for the big temps on v6e/v7x, f32 pool/MLP).
    fwd_bf16 = jax.jit(functools.partial(dehaze_block, kernel_size=K,
                                         io_dtype=jnp.bfloat16))
    out_bf16 = jax.block_until_ready(fwd_bf16(x, params))
    assert out_bf16.dtype == jnp.bfloat16
    assert jnp.allclose(out_bf16.astype(jnp.float32), ref, atol=1e-1, rtol=1e-1)

    # 4) Ragged spatial size (HW=100, not a multiple of 128): handled in-kernel
    #    with full-dim blocks / masked lane stores, no host-side pad pass.
    x_rag = jax.random.normal(ks[13], (N, C, 10, 10), dtype=jnp.float32)
    ref_rag = jax.block_until_ready(dehaze_block_ref(x_rag, params, kernel_size=K))
    out_rag = jax.block_until_ready(fwd_tiled(x_rag, params))
    assert jnp.allclose(out_rag, ref_rag, atol=5e-4, rtol=5e-4)

    print("KERNEL_OK")
</pallas_src>

<mosaic_0001>
module attributes {stable_mosaic.version = 11 : i64} {
  func.func @_tiled_ca_pa_kernel(%arg0: i32, %arg1: i32, %arg2: memref<1x32x256xf32, #tpu.memory_space<vmem>>, %arg3: memref<1x32x256xf32, #tpu.memory_space<vmem>>, %arg4: memref<1x32x1xf32, #tpu.memory_space<vmem>>, %arg5: memref<4x32xf32, #tpu.memory_space<vmem>>, %arg6: memref<4x1xf32, #tpu.memory_space<vmem>>, %arg7: memref<1x4xf32, #tpu.memory_space<vmem>>, %arg8: memref<1x1xf32, #tpu.memory_space<vmem>>, %arg9: memref<1x32x256xf32, #tpu.memory_space<vmem>>) attributes {dimension_semantics = [#tpu.dimension_semantics<parallel>, #tpu.dimension_semantics<parallel>], iteration_bounds = array<i64: 2, 1>, scalar_prefetch = 0 : i64, scratch_operands = 0 : i64, tpu.core_type = #tpu.core_type<tc>, window_params = [{transform_indices = @transform_0, window_bounds = array<i64: 1, 32, 256>}, {transform_indices = @transform_1, window_bounds = array<i64: 1, 32, 256>}, {transform_indices = @transform_2, window_bounds = array<i64: 1, 32, 1>}, {pipeline_mode = #tpu.pipeline_mode<synchronous>, transform_indices = @transform_3, window_bounds = array<i64: 4, 32>}, {pipeline_mode = #tpu.pipeline_mode<synchronous>, transform_indices = @transform_4, window_bounds = array<i64: 4, 1>}, {pipeline_mode = #tpu.pipeline_mode<synchronous>, transform_indices = @transform_5, window_bounds = array<i64: 1, 4>}, {pipeline_mode = #tpu.pipeline_mode<synchronous>, transform_indices = @transform_6, window_bounds = array<i64: 1, 1>}, {transform_indices = @transform_7, window_bounds = array<i64: 1, 32, 256>}]} {
    %c0 = arith.constant 0 : index
    %c0_0 = arith.constant 0 : index
    %c0_1 = arith.constant 0 : index
    %0 = vector.load %arg2[%c0, %c0_0, %c0_1] : memref<1x32x256xf32, #tpu.memory_space<vmem>>, vector<1x32x256xf32>
    %1 = vector.shape_cast %0 : vector<1x32x256xf32> to vector<32x256xf32>
    %c0_2 = arith.constant 0 : index
    %c0_3 = arith.constant 0 : index
    %c0_4 = arith.constant 0 : index
    %2 = vector.load %arg4[%c0_2, %c0_3, %c0_4] : memref<1x32x1xf32, #tpu.memory_space<vmem>>, vector<1x32x1xf32>
    %3 = vector.shape_cast %2 : vector<1x32x1xf32> to vector<32x1xf32>
    %4 = vector.broadcast %3 : vector<32x1xf32> to vector<32x256xf32>
    %5 = arith.mulf %1, %4 : vector<32x256xf32>
    %c0_5 = arith.constant 0 : index
    %c0_6 = arith.constant 0 : index
    %6 = vector.load %arg5[%c0_5, %c0_6] : memref<4x32xf32, #tpu.memory_space<vmem>>, vector<4x32xf32>
    %cst = arith.constant dense<0.000000e+00> : vector<4x256xf32>
    %7 = tpu.matmul %6, %5, %cst {dimension_numbers = #tpu.dot_dimension_numbers<[1], [0], [0], [1], [0, 0, 1, 1], [], []>} : vector<4x32xf32>, vector<32x256xf32>, vector<4x256xf32> -> vector<4x256xf32>
    %c0_7 = arith.constant 0 : index
    %c0_8 = arith.constant 0 : index
    %8 = vector.load %arg6[%c0_7, %c0_8] : memref<4x1xf32, #tpu.memory_space<vmem>>, vector<4x1xf32>
    %9 = vector.broadcast %8 : vector<4x1xf32> to vector<4x256xf32>
    %10 = arith.addf %7, %9 : vector<4x256xf32>
    %cst_9 = arith.constant 0.000000e+00 : f32
    %11 = vector.broadcast %cst_9 : f32 to vector<4x256xf32>
    %12 = arith.maximumf %10, %11 : vector<4x256xf32>
    %c0_10 = arith.constant 0 : index
    %c0_11 = arith.constant 0 : index
    %13 = vector.load %arg7[%c0_10, %c0_11] : memref<1x4xf32, #tpu.memory_space<vmem>>, vector<1x4xf32>
    %cst_12 = arith.constant dense<0.000000e+00> : vector<1x256xf32>
    %14 = tpu.matmul %13, %12, %cst_12 {dimension_numbers = #tpu.dot_dimension_numbers<[1], [0], [0], [1], [0, 0, 1, 1], [], []>} : vector<1x4xf32>, vector<4x256xf32>, vector<1x256xf32> -> vector<1x256xf32>
    %c0_13 = arith.constant 0 : index
    %c0_14 = arith.constant 0 : index
    %15 = vector.load %arg8[%c0_13, %c0_14] : memref<1x1xf32, #tpu.memory_space<vmem>>, vector<1x1xf32>
    %16 = vector.broadcast %15 : vector<1x1xf32> to vector<1x256xf32>
    %17 = arith.addf %14, %16 : vector<1x256xf32>
    %18 = arith.negf %17 : vector<1x256xf32>
    %19 = math.exp %18 : vector<1x256xf32>
    %cst_15 = arith.constant 1.000000e+00 : f32
    %20 = vector.broadcast %cst_15 : f32 to vector<1x256xf32>
    %21 = arith.addf %20, %19 : vector<1x256xf32>
    %22 = arith.divf %20, %21 : vector<1x256xf32>
    %23 = vector.broadcast %22 : vector<1x256xf32> to vector<32x256xf32>
    %24 = arith.mulf %5, %23 : vector<32x256xf32>
    %c0_16 = arith.constant 0 : index
    %c0_17 = arith.constant 0 : index
    %c0_18 = arith.constant 0 : index
    %25 = vector.load %arg3[%c0_16, %c0_17, %c0_18] : memref<1x32x256xf32, #tpu.memory_space<vmem>>, vector<1x32x256xf32>
    %26 = vector.shape_cast %25 : vector<1x32x256xf32> to vector<32x256xf32>
    %27 = arith.addf %24, %26 : vector<32x256xf32>
    %c0_19 = arith.constant 0 : index
    %c0_20 = arith.constant 0 : index
    %c0_21 = arith.constant 0 : index
    %28 = vector.load %arg9[%c0_19, %c0_20, %c0_21] : memref<1x32x256xf32, #tpu.memory_space<vmem>>, vector<1x32x256xf32>
    %29 = vector.shape_cast %28 : vector<1x32x256xf32> to vector<32x256xf32>
    %30 = vector.shape_cast %27 : vector<32x256xf32> to vector<1x32x256xf32>
    tpu.vector_store %arg9[%c0_19, %c0_20, %c0_21], %30 {strides = array<i32>} : memref<1x32x256xf32, #tpu.memory_space<vmem>>, vector<1x32x256xf32>,
    return
  }
  func.func @transform_0(%arg0: i32, %arg1: i32) -> (i32, i32, i32) {
    %c0_i32 = arith.constant 0 : i32
    %c0_i32_0 = arith.constant 0 : i32
    return %arg0, %c0_i32, %arg1 : i32, i32, i32
  }
  func.func @transform_1(%arg0: i32, %arg1: i32) -> (i32, i32, i32) {
    %c0_i32 = arith.constant 0 : i32
    %c0_i32_0 = arith.constant 0 : i32
    return %arg0, %c0_i32, %arg1 : i32, i32, i32
  }
  func.func @transform_2(%arg0: i32, %arg1: i32) -> (i32, i32, i32) {
    %c0_i32 = arith.constant 0 : i32
    %c0_i32_0 = arith.constant 0 : i32
    %c0_i32_1 = arith.constant 0 : i32
    return %arg0, %c0_i32, %c0_i32_0 : i32, i32, i32
  }
  func.func @transform_3(%arg0: i32, %arg1: i32) -> (i32, i32) {
    %c0_i32 = arith.constant 0 : i32
    %c0_i32_0 = arith.constant 0 : i32
    %c0_i32_1 = arith.constant 0 : i32
    return %c0_i32, %c0_i32_0 : i32, i32
  }
  func.func @transform_4(%arg0: i32, %arg1: i32) -> (i32, i32) {
    %c0_i32 = arith.constant 0 : i32
    %c0_i32_0 = arith.constant 0 : i32
    %c0_i32_1 = arith.constant 0 : i32
    return %c0_i32, %c0_i32_0 : i32, i32
  }
  func.func @transform_5(%arg0: i32, %arg1: i32) -> (i32, i32) {
    %c0_i32 = arith.constant 0 : i32
    %c0_i32_0 = arith.constant 0 : i32
    %c0_i32_1 = arith.constant 0 : i32
    return %c0_i32, %c0_i32_0 : i32, i32
  }
  func.func @transform_6(%arg0: i32, %arg1: i32) -> (i32, i32) {
    %c0_i32 = arith.constant 0 : i32
    %c0_i32_0 = arith.constant 0 : i32
    %c0_i32_1 = arith.constant 0 : i32
    return %c0_i32, %c0_i32_0 : i32, i32
  }
  func.func @transform_7(%arg0: i32, %arg1: i32) -> (i32, i32, i32) {
    %c0_i32 = arith.constant 0 : i32
    %c0_i32_0 = arith.constant 0 : i32
    return %arg0, %c0_i32, %arg1 : i32, i32, i32
  }
}

</mosaic_0001>

<bundles_post_ra>
// kernel: dehaze_block.1
= control target key start
LH: loop header
LB: loop body
LE: loop exit
PB: predicated region body
PF: predicated region fallthrough
CT: control target
= control target key end

     0   :  { %s900_s26 = smov 0   ;;  %s902_s27 = smov 0   ;;  %s973_s0 = inlined_call_operand.vmem [shape: f32[2,32,256], index: 0, kind: input, shape index: {}]   ;;  %s974_s1 = inlined_call_operand.vmem [shape: f32[2,32,256], index: 1, kind: input, shape index: {}]   ;;  %s975_s2 = inlined_call_operand.vmem [shape: f32[2,32,1], index: 2, kind: input, shape index: {}]   ;;  %s976_s3 = inlined_call_operand.vmem [shape: f32[4,32], index: 3, kind: input, shape index: {}]   ;;  %s977_s4 = inlined_call_operand.vmem [shape: f32[4,1], index: 4, kind: input, shape index: {}]   ;;  %s978_s5 = inlined_call_operand.vmem [shape: f32[1,4], index: 5, kind: input, shape index: {}]   ;;  %s979_s6 = inlined_call_operand.<no memory space> [shape: f32[1,1], index: 6, kind: input, shape index: {}]   ;;  %s980_s7 = inlined_call_operand.vmem [shape: f32[2,32,256], index: 7, kind: output, shape index: {}]  }
   0x1   :  { %v12_v0 = vstv %s979_s6  ;;  %s904_s28 = smov 0  }
   0x2   :  { %13 = vst [vmem:[#allocation2] sm:$0x1] %v12_v0 }
   0x3 LB: > { %s31_s6 = sadd.s32 1, %s849_s27  ;;  %p766_p0 = scmp.ge.s32.totalorder %s853_s28, 1  ;;  %s853_s28 = sphi %s904_s28, %s19_s28   ;;  %s849_s27 = sphi %s902_s27, %s982_s27   ;;  %s845_s26 = sphi %s900_s26, %s981_s26  }
   0x4   : > { %p33_p1 = scmp.ge.s32.totalorder %s31_s6, 2  ;;  %p287_p2 = scmp.lt.s32.totalorder %s853_s28, 3 }
   0x6   : > { %s984_s6 = smov (%p33_p1, %s31_s6), 0  ;;  %p288_p3 = pnand %p766_p0, %p287_p2 }
   0x7   : > { %p342_p4 = scmp.lt.s32.totalorder (!%p288_p3), %s845_s26, 1  ;;  %v855_v1 = vmov (!%p288_p3), 0   ;;  %v417_v7 = vld [vmem:[%s977_s4] sm:$0xf] (!%p288_p3)  ;;  %v856_v8 = vmov (!%p288_p3), 0.0   ;;  %vm423_vm0 = vcmask (!%p288_p3), 261120   ;;  %v507_v42 = vlaneseq (!%p288_p3) }
   0x8   : > { %291 = sbr.rel (%p288_p3) target bundleno = 632 (0x278), region = 48  ;;  %822 = vset.pattern.permute.xlu1 (!%p288_p3), %v855_v1  ;;  %821 = vset.pattern.permute.xlu0 (!%p288_p3), %v855_v1  ;;  %v416_v33 = vld [vmem:[%s976_s3] sm:$0xf] (!%p288_p3)  ;;  %vm515_vm1 = vcmask (!%p288_p3), 1043456   ;;  %vm511_vm2 = vcmask (!%p288_p3), 31744  }
   0x9   : > { %v501_v6 = vld [vmem:[#allocation2] sm:$0x1] (!%p288_p3)  ;;  %491 = vmatprep.mubr.f32.mxu0 (!%p288_p3), %v856_v8  ;;  %586 = vmatprep.mubr.f32.mxu1 (!%p288_p3), %v856_v8  ;;  %v508_v43 = vshrl.u32 (!%p288_p3), %v507_v42, 7 }
   0xa   : > { %v500_v41 = vld [vmem:[%s978_s5] sm:$0x1] (!%p288_p3) }
   0xb   : > { %v509_v44 = vsub.s32 (!%p288_p3), 0, %v508_v43 }
   0xf   : > { %s986_s26 = smov (!%p342_p4, %s845_s26), 1 }
  0x10   : > { %s785_s29 = sshll.u32 %s986_s26, 5  ;;  %s924_s12 = sshll.u32 %s986_s26, 6 }
  0x11   : > { %s365_s9 = scalar_lea.vmem %s975_s2, %s785_s29  ;;  %s349_s15 = scalar_lea.vmem %s973_s0, %s924_s12 }
  0x12   : > { %v386_v2 = vld [vmem:[%s365_s9 + $0x10] sm:$0xff]  ;;  %v384_v3 = vld [vmem:[%s365_s9] sm:$0xff]  ;;  %v387_v4 = vld [vmem:[%s365_s9 + $0x18] sm:$0xff]  ;;  %s359_s22 = scalar_lea.vmem %s974_s1, %s924_s12  ;;  %s374_s25 = scalar_lea.vmem %s980_s7, %s924_s12 }
  0x13   : > { %400 = vperm.xlu1 %822, %v386_v2   ;;  %390 = vperm.xlu0 %821, %v384_v3   ;;  %v385_v5 = vld [vmem:[%s365_s9 + $0x8] sm:$0xff]  ;;  %v376_v12 = vld [vmem:[%s349_s15] sm:$0xff]  ;;  %v383_v14 = vld [vmem:[%s349_s15 + $0x38] sm:$0xff] }
  0x14   : > { %v381_v11 = vld [vmem:[%s349_s15 + $0x28] sm:$0xff]  ;;  %v378_v15 = vld [vmem:[%s349_s15 + $0x10] sm:$0xff]  ;;  %v379_v16 = vld [vmem:[%s349_s15 + $0x18] sm:$0xff] }
  0x15   : > { %v377_v13 = vld [vmem:[%s349_s15 + $0x8] sm:$0xff]  ;;  %v380_v21 = vld [vmem:[%s349_s15 + $0x20] sm:$0xff]  ;;  %v382_v23 = vld [vmem:[%s349_s15 + $0x30] sm:$0xff] }
  0x16   : > { %v621_v60 = vld [vmem:[%s359_s22] sm:$0xff]  ;;  %v623_v61 = vld [vmem:[%s359_s22 + $0x10] sm:$0xff]  ;;  %v622_v1 = vld [vmem:[%s359_s22 + $0x8] sm:$0xff] }
  0x17   : > { %405 = vperm.xlu1 %822, %v387_v4   ;;  %395 = vperm.xlu0 %821, %v385_v5   ;;  %v625_v62 = vld [vmem:[%s359_s22 + $0x20] sm:$0xff]  ;;  %v627_v63 = vld [vmem:[%s359_s22 + $0x30] sm:$0xff]  ;;  %v628_v8 = vld [vmem:[%s359_s22 + $0x38] sm:$0xff] }
  0x1b   : > { %504 = vperm.xlu1 %822, %v501_v6   ;;  %420 = vperm.xlu0 %821, %v417_v7   ;;  %v624_v6 = vld [vmem:[%s359_s22 + $0x18] sm:$0xff]  ;;  %v626_v7 = vld [vmem:[%s359_s22 + $0x28] sm:$0xff] }
  0x92   : > { %v401_v9 = vpop.permute.xlu1 %400  ;;  %v391_v10 = vpop.permute.xlu0 %390 }
  0x93   : > { %v930_v17 = vmul.f32 %v401_v9, %v381_v11  ;;  %v932_v18 = vmul.f32 %v391_v10, %v376_v12  ;;  %v934_v22 = vmul.f32 %v391_v10, %v377_v13  ;;  %v412_v29 = vmul.f32 %v401_v9, %v380_v21 }
  0x96   : > { %v406_v19 = vpop.permute.xlu1 %405  ;;  %v396_v20 = vpop.permute.xlu0 %395 }
  0x97   : > { %v936_v24 = vmul.f32 %v406_v19, %v383_v14  ;;  %v410_v25 = vmul.f32 %v396_v20, %v378_v15  ;;  %v938_v26 = vmul.f32 %v396_v20, %v379_v16  ;;  %v414_v30 = vmul.f32 %v406_v19, %v382_v23 }
  0x99   : > { %v787_v27 = vpack.c.bf16 %v938_v26, %v934_v22  ;;  %v789_v28 = vpack.c.bf16 %v410_v25, %v932_v18  ;;  %v791_v31 = vpack.c.bf16 %v936_v24, %v930_v17  ;;  %v793_v32 = vpack.c.bf16 %v414_v30, %v412_v29 }
  0x9a   : > { %v421_v34 = vpop.permute.xlu0 %420  ;;  %v505_v45 = vpop.permute.xlu1 %504 }
  0x9b   : > { %788 = vmatprep.subr.bf16.mxu0 %v787_v27  ;;  %v510_v46 = vrot.slane %v505_v45, %v509_v44 }
  0x9c   : > { %790 = vmatpush1.bf16.msra.mxu0 %v789_v28 }
  0x9d   : > { %792 = vmatprep.subr.bf16.mxu0 %v791_v31 }
  0xa0   : > { %794 = vmatpush1.bf16.msra.mxu0 %v793_v32 }
  0xa3   : > { %775 = vmatmul.mubr.msk.f32.vlgmr.msra.gmra.mrb[0].mxu0 %vm423_vm0, %v416_v33 }
 0x176   : > { %v493_v35 = vpop.f32.mrb[0].mxu0 }
 0x177   : > { %v494_v36 = vadd.f32 %v493_v35, %v421_v34  ;;  %v495_v37 = vpop.f32.mrb[1].mxu0 }
 0x178   : > { %v496_v38 = vadd.f32 %v495_v37, %v421_v34 }
 0x179   : > { %v498_v40 = vmax.f32 %v494_v36, 0.0 }
 0x17a   : > { %v499_v39 = vmax.f32 %v496_v38, 0.0 }
 0x17c   : > { %776 = vmatprep.subr.msk.mxu1 %vm515_vm1, %v499_v39 }
 0x17d   : > { %777 = vmatpush1.msk.msra.mxu1 %vm515_vm1, %v498_v40 }
 0x17e   : > { %778 = vmatmul.mubr.msk.f32.vlgmr.msra.gmra.mrb[0].mxu1 %vm511_vm2, %v500_v41 }
 0x251   : > { %v588_v47 = vpop.f32.mrb[0].mxu1 }
 0x252   : > { %v589_v48 = vadd.f32 %v588_v47, %v510_v46  ;;  %v590_v49 = vpop.f32.mrb[1].mxu1 }
 0x253   : > { %v591_v50 = vadd.f32 %v590_v49, %v510_v46 }
 0x254   : > { %v779_v51 = vmul.f32 -1.442695, %v589_v48 }
 0x255   : > { %v780_v52 = vmul.f32 -1.442695, %v591_v50 }
 0x256   : > { %823 = vpow2.f32 %v779_v51 }
 0x257   : > { %825 = vpow2.f32 %v780_v52 }
 0x260   : > { %v824_v53 = vpop.eup %823 }
 0x261   : > { %v826_v54 = vpop.eup %825  ;;  %v599_v55 = vadd.f32 1.0, %v824_v53 }
 0x262   : > { %v600_v56 = vadd.f32 1.0, %v826_v54 }
 0x263   : > { %827 = vrcp.f32 %v599_v55 }
 0x264   : > { %829 = vrcp.f32 %v600_v56 }
 0x26d   : > { %v828_v57 = vpop.eup %827 }
 0x26e   : > { %v830_v58 = vpop.eup %829  ;;  %v608_v59 = vrot.slane %v828_v57, %v509_v44 }
 0x26f   : > { %v612_v0 = vrot.slane %v830_v58, %v509_v44 }
 0x270   : > { %v613_v2 = vmul.f32 %v608_v59, %v932_v18  ;;  %v615_v3 = vmul.f32 %v608_v59, %v410_v25  ;;  %v617_v4 = vmul.f32 %v608_v59, %v412_v29  ;;  %v619_v5 = vmul.f32 %v608_v59, %v414_v30 }
 0x271   : > { %v614_v9 = vmul.f32 %v612_v0, %v934_v22  ;;  %v616_v10 = vmul.f32 %v612_v0, %v938_v26  ;;  %v618_v11 = vmul.f32 %v612_v0, %v930_v17  ;;  %v620_v12 = vmul.f32 %v612_v0, %v936_v24 }
 0x272   : > { %v629_v13 = vadd.f32 %v621_v60, %v613_v2  ;;  %v631_v14 = vadd.f32 %v623_v61, %v615_v3  ;;  %v633_v15 = vadd.f32 %v625_v62, %v617_v4  ;;  %v635_v16 = vadd.f32 %v627_v63, %v619_v5 }
 0x273   : > { %v630_v18 = vadd.f32 %v622_v1, %v614_v9  ;;  %v632_v19 = vadd.f32 %v624_v6, %v616_v10  ;;  %v634_v20 = vadd.f32 %v626_v7, %v618_v11  ;;  %v636_v21 = vadd.f32 %v628_v8, %v620_v12 }
 0x274   : > { %637 = vst [vmem:[%s374_s25] sm:$0xff] %v629_v13  ;;  %639 = vst [vmem:[%s374_s25 + $0x10] sm:$0xff] %v631_v14 }
 0x275   : > { %641 = vst [vmem:[%s374_s25 + $0x20] sm:$0xff] %v633_v15  ;;  %643 = vst [vmem:[%s374_s25 + $0x30] sm:$0xff] %v635_v16 }
 0x276   : > { %638 = vst [vmem:[%s374_s25 + $0x8] sm:$0xff] %v630_v18  ;;  %640 = vst [vmem:[%s374_s25 + $0x18] sm:$0xff] %v632_v19 }
 0x277   : > { %642 = vst [vmem:[%s374_s25 + $0x28] sm:$0xff] %v634_v20  ;;  %644 = vst [vmem:[%s374_s25 + $0x38] sm:$0xff] %v636_v21 }
 0x278 PF: > { %s19_s28 = sadd.s32 1, %s853_s28   ;;  %s981_s26 = smov %s849_s27 }
 0x279   : > { %p16_p5 = scmp.ge.s32.totalorder %s19_s28, 4   ;;  %s982_s27 = smov %s984_s6 }
 0x27b   :  { %18 = sbr.rel (!%p16_p5) target bundleno = 3 (0x3), region = 84 }

</bundles_post_ra>
